<compile_context>
chip_gen: v5e
topology: v5e:2x2
jax: 0.10.0
libtpu: 0.0.40
codegen_flags: <defaults>
</compile_context>

<pallas_src>
import functools

import jax
import jax.numpy as jnp
from jax.experimental import pallas as pl
from jax.experimental.pallas import tpu as pltpu


def _focal_loss_kernel(t_ref, x_ref, out_ref, *,
                       gamma, confidence, smooth_val, n_rows, tile_n):
    pid = pl.program_id(0)

    x = x_ref[...].astype(jnp.float32)          # (tile_n, C) logits (cast in VMEM)
    t = t_ref[...]                              # (tile_n, 1) int32 class ids

    # Numerically-stable softmax / log-softmax along the class (lane) axis.
    m = jnp.max(x, axis=1, keepdims=True)       # (tile_n, 1)
    z = x - m                                   # (tile_n, C)
    ex = jnp.exp(z)                             # (tile_n, C)   (EUP)
    s = jnp.sum(ex, axis=1, keepdims=True)      # (tile_n, 1)   (XLU)
    logpt = z - jnp.log(s)                      # log_softmax
    inv_s = pl.reciprocal(s, approx=True)       # cheap EUP reciprocal
    pt = ex * inv_s                             # softmax

    one_minus_pt = 1.0 - pt

    # Focal weighting, specialised at trace time (gamma is a Python float).
    if gamma == 0.0:
        w = logpt
    else:
        if gamma == 1.0:
            focal = one_minus_pt
        elif gamma == 2.0:
            focal = one_minus_pt * one_minus_pt
        elif float(gamma).is_integer() and 0.0 < gamma <= 8.0:
            focal = one_minus_pt
            for _ in range(int(gamma) - 1):
                focal = focal * one_minus_pt
        else:
            # Non-integer gamma fallback: guard log(0) when pt == 1.
            safe = jnp.maximum(one_minus_pt, jnp.float32(1e-30))
            focal = jnp.exp(jnp.float32(gamma) * jnp.log(safe))
        w = focal * logpt                        # (tile_n, C)

    # Split class reduction:
    #   sum_c true_dist_c * w_c = smooth * sum_c(w_c) + (conf - smooth) * w_t
    col = jax.lax.broadcasted_iota(jnp.int32, w.shape, 1)          # (tile_n, C)
    sum_all = jnp.sum(w, axis=1, keepdims=True)                    # (tile_n, 1)
    w_tgt = jnp.sum(jnp.where(col == t, w, 0.0), axis=1, keepdims=True)
    per_row = -(jnp.float32(smooth_val) * sum_all
                + jnp.float32(confidence - smooth_val) * w_tgt)    # (tile_n, 1)

    # Mask rows past the true batch size (partial last tile / padded garbage).
    row = jax.lax.broadcasted_iota(jnp.int32, per_row.shape, 0) + pid * tile_n
    per_row = jnp.where(row < n_rows, per_row, jnp.float32(0.0))

    # Per-tile partial sum, written to lane 0 of a lane-dense 128-wide block.
    tile_sum = jnp.sum(per_row)
    lane = jax.lax.broadcasted_iota(jnp.int32, (1, 1, 128), 2)
    out_ref[...] = jnp.where(lane == 0, tile_sum, jnp.float32(0.0))


def label_smoothed_focal_loss(logits, target, *, n_classes, gamma=1.0, alpha=0.1,
                              size_average=True):
    """Forward pass of LabelSmoothedFocalLoss. Returns (dict(loss=loss), 0, 0).

    `logits` should be passed in its native dtype (e.g. bf16); the kernel casts
    to f32 internally — do not pre-cast to f32 on the host.
    """
    # TODO(synk): size_average is accepted for API parity only; the PyTorch
    # forward always applies .mean(), so it is ignored here as well.
    del size_average

    N, C = logits.shape
    assert C == n_classes
    confidence = 1.0 - alpha
    smooth_val = alpha / (n_classes - 1)

    # Row-tile sizing: cap the f32 logits tile at ~2 MiB so the double-buffered
    # input plus ~5-6 live f32 temporaries stays well inside v7x's VMEM.
    target_tile_bytes = 2 * 1024 * 1024
    max_rows = max(8, min(512, (target_tile_bytes // (C * 4)) // 8 * 8))
    tile_n = int(N) if N <= max_rows else int(max_rows)
    num_tiles = pl.cdiv(int(N), tile_n)

    target_2d = target.astype(jnp.int32).reshape(N, 1)

    kernel = functools.partial(
        _focal_loss_kernel,
        gamma=float(gamma),
        confidence=float(confidence),
        smooth_val=float(smooth_val),
        n_rows=int(N),
        tile_n=int(tile_n),
    )

    partials = pl.pallas_call(
        kernel,
        out_shape=jax.ShapeDtypeStruct((num_tiles, 1, 128), jnp.float32),
        grid=(num_tiles,),
        in_specs=[
            pl.BlockSpec((tile_n, 1), lambda i: (i, 0)),   # target (tile_n, 1)
            pl.BlockSpec((tile_n, C), lambda i: (i, 0)),   # logits (tile_n, C)
        ],
        out_specs=pl.BlockSpec((1, 1, 128), lambda i: (i, 0, 0)),
        compiler_params=pltpu.CompilerParams(
            dimension_semantics=("parallel",),     # independent tiles -> megacore
            vmem_limit_bytes=32 * 1024 * 1024,
        ),
    )(target_2d, logits)

    # Tiny final reduction + batch mean done by XLA outside the kernel.
    loss = jnp.sum(partials) / jnp.float32(N)
    return dict(loss=loss), 0, 0


def _reference(logits, target, *, n_classes, gamma=1.0, alpha=0.1):
    x = logits.astype(jnp.float32)
    logpt = jax.nn.log_softmax(x, axis=1)
    pt = jax.nn.softmax(x, axis=1)
    true_dist = jnp.full_like(logpt, alpha / (n_classes - 1))
    true_dist = true_dist.at[jnp.arange(x.shape[0]), target].set(1.0 - alpha)
    return jnp.mean(-jnp.sum(true_dist * (1.0 - pt) ** gamma * logpt, axis=1))


if __name__ == "__main__":
    N, C = 8, 32   # batch = 8 rows, n_classes = 32
    key = jax.random.PRNGKey(0)
    k_x, k_t = jax.random.split(key)
    logits = jax.random.normal(k_x, (N, C), dtype=jnp.float32)
    target = jax.random.randint(k_t, (N,), 0, C, dtype=jnp.int32)

    # Exercise the specialised integer-gamma paths and the non-integer fallback.
    for gamma in (1.0, 2.0, 1.5):
        out, aux0, aux1 = label_smoothed_focal_loss(
            logits, target, n_classes=C, gamma=gamma, alpha=0.1)
        loss = jax.block_until_ready(out["loss"])
        ref = _reference(logits, target, n_classes=C, gamma=gamma, alpha=0.1)
        # Tolerance accounts for the approximate (EUP) reciprocal used for pt.
        assert jnp.allclose(loss, ref, rtol=2e-3, atol=2e-3), (gamma, loss, ref)

    print("KERNEL_OK")
</pallas_src>

<mosaic_0001>
module attributes {stable_mosaic.version = 11 : i64} {
  func.func @_focal_loss_kernel(%arg0: i32, %arg1: memref<8x1xi32, #tpu.memory_space<vmem>>, %arg2: memref<8x32xf32, #tpu.memory_space<vmem>>, %arg3: memref<1x1x128xf32, #tpu.memory_space<vmem>>) attributes {dimension_semantics = [#tpu.dimension_semantics<parallel>], iteration_bounds = array<i64: 1>, scalar_prefetch = 0 : i64, scratch_operands = 0 : i64, tpu.core_type = #tpu.core_type<tc>, window_params = [{transform_indices = @transform_0, window_bounds = array<i64: 8, 1>}, {transform_indices = @transform_1, window_bounds = array<i64: 8, 32>}, {transform_indices = @transform_2, window_bounds = array<i64: 1, 1, 128>}]} {
    %c0 = arith.constant 0 : index
    %c0_0 = arith.constant 0 : index
    %0 = vector.load %arg2[%c0, %c0_0] : memref<8x32xf32, #tpu.memory_space<vmem>>, vector<8x32xf32>
    %c0_1 = arith.constant 0 : index
    %c0_2 = arith.constant 0 : index
    %1 = vector.load %arg1[%c0_1, %c0_2] : memref<8x1xi32, #tpu.memory_space<vmem>>, vector<8x1xi32>
    %cst = arith.constant dense<0xFF800000> : vector<8xf32>
    %2 = vector.multi_reduction <maximumf>, %0, %cst [1] : vector<8x32xf32> to vector<8xf32>
    %3 = vector.shape_cast %2 : vector<8xf32> to vector<8x1xf32>
    %4 = vector.broadcast %3 : vector<8x1xf32> to vector<8x32xf32>
    %5 = arith.subf %0, %4 : vector<8x32xf32>
    %6 = math.exp %5 : vector<8x32xf32>
    %cst_3 = arith.constant dense<0.000000e+00> : vector<8xf32>
    %7 = vector.multi_reduction <add>, %6, %cst_3 [1] : vector<8x32xf32> to vector<8xf32>
    %8 = vector.shape_cast %7 : vector<8xf32> to vector<8x1xf32>
    %9 = math.log %8 : vector<8x1xf32>
    %10 = vector.broadcast %9 : vector<8x1xf32> to vector<8x32xf32>
    %11 = arith.subf %5, %10 : vector<8x32xf32>
    %12 = tpu.reciprocal %8 {approx = true} : vector<8x1xf32> -> vector<8x1xf32>
    %13 = vector.broadcast %12 : vector<8x1xf32> to vector<8x32xf32>
    %14 = arith.mulf %6, %13 : vector<8x32xf32>
    %cst_4 = arith.constant 1.000000e+00 : f32
    %15 = vector.broadcast %cst_4 : f32 to vector<8x32xf32>
    %16 = arith.subf %15, %14 : vector<8x32xf32>
    %17 = arith.mulf %16, %11 : vector<8x32xf32>
    %18 = tpu.iota {dimensions = array<i32: 1>} : vector<8x32xi32>
    %cst_5 = arith.constant dense<0.000000e+00> : vector<8xf32>
    %19 = vector.multi_reduction <add>, %17, %cst_5 [1] : vector<8x32xf32> to vector<8xf32>
    %20 = vector.shape_cast %19 : vector<8xf32> to vector<8x1xf32>
    %21 = vector.broadcast %1 : vector<8x1xi32> to vector<8x32xi32>
    %22 = arith.cmpi eq, %18, %21 : vector<8x32xi32>
    %cst_6 = arith.constant 0.000000e+00 : f32
    %23 = vector.broadcast %cst_6 : f32 to vector<8x32xf32>
    %24 = arith.select %22, %17, %23 : vector<8x32xi1>, vector<8x32xf32>
    %cst_7 = arith.constant dense<0.000000e+00> : vector<8xf32>
    %25 = vector.multi_reduction <add>, %24, %cst_7 [1] : vector<8x32xf32> to vector<8xf32>
    %26 = vector.shape_cast %25 : vector<8xf32> to vector<8x1xf32>
    %cst_8 = arith.constant 0.0032258064 : f32
    %27 = vector.broadcast %cst_8 : f32 to vector<8x1xf32>
    %28 = arith.mulf %27, %20 : vector<8x1xf32>
    %cst_9 = arith.constant 0.896774172 : f32
    %29 = vector.broadcast %cst_9 : f32 to vector<8x1xf32>
    %30 = arith.mulf %29, %26 : vector<8x1xf32>
    %31 = arith.addf %28, %30 : vector<8x1xf32>
    %cst_10 = arith.constant 0.000000e+00 : f32
    %32 = vector.broadcast %cst_10 : f32 to vector<8x1xf32>
    %33 = arith.subf %32, %31 : vector<8x1xf32>
    %34 = tpu.iota {dimensions = array<i32: 0>} : vector<8x1xi32>
    %c8_i32 = arith.constant 8 : i32
    %35 = arith.muli %arg0, %c8_i32 : i32
    %36 = vector.broadcast %35 : i32 to vector<8x1xi32>
    %37 = arith.addi %34, %36 : vector<8x1xi32>
    %c8_i32_11 = arith.constant 8 : i32
    %38 = vector.broadcast %c8_i32_11 : i32 to vector<8x1xi32>
    %39 = arith.cmpi slt, %37, %38 : vector<8x1xi32>
    %cst_12 = arith.constant 0.000000e+00 : f32
    %40 = vector.broadcast %cst_12 : f32 to vector<8x1xf32>
    %41 = arith.select %39, %33, %40 : vector<8x1xi1>, vector<8x1xf32>
    %42 = vector.shape_cast %41 : vector<8x1xf32> to vector<1x8x1xf32>
    %cst_13 = arith.constant dense<0.000000e+00> : vector<1xf32>
    %43 = vector.multi_reduction <add>, %42, %cst_13 [1, 2] : vector<1x8x1xf32> to vector<1xf32>
    %44 = vector.shape_cast %43 : vector<1xf32> to vector<1x1x1xf32>
    %45 = vector.extract %44[0, 0, 0] : f32 from vector<1x1x1xf32>
    %46 = tpu.iota {dimensions = array<i32: 2>} : vector<1x1x128xi32>
    %c0_i32 = arith.constant 0 : i32
    %47 = vector.broadcast %c0_i32 : i32 to vector<1x1x128xi32>
    %48 = arith.cmpi eq, %46, %47 : vector<1x1x128xi32>
    %cst_14 = arith.constant 0.000000e+00 : f32
    %49 = vector.broadcast %45 : f32 to vector<1x1x128xf32>
    %50 = vector.broadcast %cst_14 : f32 to vector<1x1x128xf32>
    %51 = arith.select %48, %49, %50 : vector<1x1x128xi1>, vector<1x1x128xf32>
    %c0_15 = arith.constant 0 : index
    %c0_16 = arith.constant 0 : index
    %c0_17 = arith.constant 0 : index
    %52 = vector.load %arg3[%c0_15, %c0_16, %c0_17] : memref<1x1x128xf32, #tpu.memory_space<vmem>>, vector<1x1x128xf32>
    tpu.vector_store %arg3[%c0_15, %c0_16, %c0_17], %51 {strides = array<i32>} : memref<1x1x128xf32, #tpu.memory_space<vmem>>, vector<1x1x128xf32>,
    return
  }
  func.func @transform_0(%arg0: i32) -> (i32, i32) {
    %c0_i32 = arith.constant 0 : i32
    %c0_i32_0 = arith.constant 0 : i32
    return %arg0, %c0_i32 : i32, i32
  }
  func.func @transform_1(%arg0: i32) -> (i32, i32) {
    %c0_i32 = arith.constant 0 : i32
    %c0_i32_0 = arith.constant 0 : i32
    return %arg0, %c0_i32 : i32, i32
  }
  func.func @transform_2(%arg0: i32) -> (i32, i32, i32) {
    %c0_i32 = arith.constant 0 : i32
    %c0_i32_0 = arith.constant 0 : i32
    %c0_i32_1 = arith.constant 0 : i32
    return %arg0, %c0_i32, %c0_i32_0 : i32, i32, i32
  }
}

</mosaic_0001>

<bundles_post_ra>
// kernel: tpu_custom_call.1
= control target key start
LH: loop header
LB: loop body
LE: loop exit
PB: predicated region body
PF: predicated region fallthrough
CT: control target
= control target key end

     0   :  { %vm14_vm0 = vcmask 261120   ;;  %s154_s0 = inlined_call_operand.vmem [shape: s32[8,1], index: 0, kind: input, shape index: {}]   ;;  %s155_s1 = inlined_call_operand.vmem [shape: f32[8,32], index: 1, kind: input, shape index: {}]   ;;  %s156_s2 = inlined_call_operand.hbm [shape: f32[1,1,128], index: 2, kind: output, shape index: {}]  }
   0x1   :  { %v12_v0 = vld [vmem:[%s155_s1] sm:$0xff] }
   0x2   :  { %7 = vsyncpa [#allocation3], 0  ;;  %v15_v1 = vsel %vm14_vm0, %v12_v0, -inf  ;;  %v13_v2 = vld [vmem:[%s154_s0] sm:$0xff]  ;;  %v124_v3 = vmov 0   ;;  %v31_v10 = vlaneseq  ;;  %vm55_vm2 = vcmask 7168  }
   0x3   :  { %16 = vmax.xlane.f32.xlu0 %v15_v1  ;;  %90 = vset.pattern.permute.xlu1 %v124_v3  ;;  %s125_s0 = smov [#allocation2]   ;;  %s77_s15 = sshll.u32 %s156_s2, 4  ;;  %s78_s15 = int_to_ptr.hbm [resolvable:$true] %s77_s15 }
   0x4   :  { %91 = vset.pattern.permute.xlu0 %v124_v3  ;;  %37 = vperm.xlu1 %90, %v13_v2   ;;  %v32_v14 = vand.u32 127, %v31_v10  ;;  %s75_s1 = sshll.u32 %s125_s0, 4  ;;  %s76_s1 = int_to_ptr.vmem [resolvable:$true] %s75_s1 }
   0x6   :  { %vm66_vm3 = vcmp.eq.s32.totalorder %v32_v14, 0 }
  0x76   :  { %v17_v4 = vpop.xlane.xlu0 %16  ;;  %v38_v15 = vpop.permute.xlu1 %37 }
  0x77   :  { %v18_v5 = vsub.f32 %v12_v0, %v17_v4  ;;  %vm39_vm1 = vcmp.eq.s32.totalorder %v32_v14, %v38_v15 }
  0x79   :  { %v19_v6 = vmul.f32 1.442695, %v18_v5 }
  0x7b   :  { %92 = vpow2.f32 %v19_v6 }
  0x81   :  { %v93_v7 = vpop.eup %92 }
  0x82   :  { %v21_v8 = vsel %vm14_vm0, %v93_v7, 0.0 }
  0x83   :  { %22 = vadd.xlane.f32.xlu0 %v21_v8 }
  0xf6   :  { %v23_v9 = vpop.xlane.xlu0 %22 }
  0xf7   :  { %94 = vlog2.f32 %v23_v9 }
  0xf8   :  { %96 = vrcp.f32 %v23_v9 }
  0xfd   :  { %v95_v11 = vpop.eup %94 }
  0xfe   :  { %v97_v12 = vpop.eup %96  ;;  %v25_v13 = vmul.f32 0.6931472, %v95_v11 }
  0xff   :  { %v28_v16 = vmul.f32 %v97_v12, %v93_v7 }
 0x100   :  { %v26_v17 = vsub.f32 %v18_v5, %v25_v13 }
 0x101   :  { %v29_v18 = vsub.f32 1.0, %v28_v16 }
 0x103   :  { %v30_v19 = vmul.f32 %v29_v18, %v26_v17 }
 0x105   :  { %v33_v20 = vsel %vm14_vm0, %v30_v19, 0.0  ;;  %v40_v21 = vsel %vm39_vm1, %v30_v19, 0.0 }
 0x106   :  { %34 = vadd.xlane.f32.xlu1 %v33_v20  ;;  %v41_v22 = vsel %vm14_vm0, %v40_v21, 0.0 }
 0x107   :  { %42 = vadd.xlane.f32.xlu2 %v41_v22 }
 0x179   :  { %v35_v23 = vpop.xlane.xlu1 %34 }
 0x17a   :  { %v44_v24 = vmul.f32 0.0032258064, %v35_v23  ;;  %v43_v25 = vpop.xlane.xlu2 %42 }
 0x17b   :  { %v45_v26 = vmul.f32 0.8967742, %v43_v25 }
 0x17d   :  { %v46_v27 = vadd.f32 %v45_v26, %v44_v24 }
 0x17f   :  { %v47_v28 = vsub.f32 0.0, %v46_v27 }
 0x181   :  { %v56_v29 = vsel %vm55_vm2, %v47_v28, 0.0 }
 0x182   :  { %57 = vadd.xlane.f32.xlu2 %v56_v29 }
 0x1f5   :  { %v58_v30 = vpop.xlane.xlu2 %57 }
 0x1f6   :  { %v59_v31 = vrot.slane %v58_v30, 4 }
 0x1f8   :  { %v60_v32 = vadd.f32 %v59_v31, %v58_v30 }
 0x1fa   :  { %v61_v33 = vrot.slane %v60_v32, 2 }
 0x1fc   :  { %v62_v34 = vadd.f32 %v61_v33, %v60_v32 }
 0x1fe   :  { %v63_v35 = vrot.slane %v62_v34, 1 }
 0x200   :  { %v64_v36 = vadd.f32 %v63_v35, %v62_v34 }
 0x202   :  { %86 = vpush %v64_v36 }
 0x233   :  { %s87_s16 = spop %86 }
 0x234   :  { %v67_v37 = vstv %s87_s16 }
 0x235   :  { %v68_v38 = vsel %vm66_vm3, %v67_v37, 0.0 }
 0x236   :  { %69 = vst [vmem:[#allocation2] sm:$0x1] %v68_v38 }
 0x237   :  { %80 = dma.vmem_to_hbm [thread:$0]  %s76_s1, 16, %s78_s15, [#allocation3]  }
 0x238   :  { %122 = dma.done.wait [#allocation3], 16  }
 0x239   :  { %123 = vsyncadd [#allocation3], 4294967280 }
 0x23a   :  { %85 = vsyncpa [#allocation3], 1 }

</bundles_post_ra>
